<compile_context>
chip_gen: v7x
topology: tpu7x:2x2x1
jax: 0.10.0
libtpu: 0.0.40
codegen_flags: <defaults>
</compile_context>

<pallas_src>
import functools

import jax
import jax.numpy as jnp
from jax import lax
from jax.experimental import pallas as pl
from jax.experimental.pallas import tpu as pltpu

LOG_STD_MIN = -5.0
LOG_STD_MAX = 0.1

_LANE = 128
_ROW_ALIGN = 16          # bf16 output sublane packing
_BATCH_TILE_CAP = 512    # v6e measured: 512-row tiles ~85% of HBM roofline

# Lazily resolved: does this jax accept pl.Buffered(1) on weight BlockSpecs?
_SINGLE_BUFFER_OK = None


def _round_up(x, m):
    return (x + m - 1) // m * m


# --------------------------------------------------------------------------- #
# Kernel
# --------------------------------------------------------------------------- #
def _policy_kernel(s_ref, w1_ref, b1_ref, w2_ref, b2_ref, wh_ref, bh_ref, out_ref):
    # bf16 MXU operands, f32 accumulation + f32 elementwise everywhere.
    # NOTE: inter-layer activations are cast to bf16 for the MXU; expected error
    # vs. an f32 reference is ~1e-2 relative (documented, acceptable for SAC).
    x = s_ref[...].astype(jnp.bfloat16)

    # linear1 + relu
    h1 = jnp.dot(x, w1_ref[...], preferred_element_type=jnp.float32) + b1_ref[...]
    h1 = jnp.maximum(h1, 0.0)

    # linear2 + relu
    h2 = jnp.dot(h1.astype(jnp.bfloat16), w2_ref[...],
                 preferred_element_type=jnp.float32) + b2_ref[...]
    h2 = jnp.maximum(h2, 0.0)

    # fused heads: columns [0, half) = mean, [half, 2*half) = log_std (pre-tanh)
    head = jnp.dot(h2.astype(jnp.bfloat16), wh_ref[...],
                   preferred_element_type=jnp.float32) + bh_ref[...]
    half = head.shape[-1] // 2          # static

    # tanh + affine on every lane (EUP/VPU slots are idle here), then select the
    # log_std half by lane index -> one full-width, unmasked, lane-dense store.
    ls = LOG_STD_MIN + 0.5 * (LOG_STD_MAX - LOG_STD_MIN) * (jnp.tanh(head) + 1.0)
    col = lax.broadcasted_iota(jnp.int32, head.shape, 1)
    out = jnp.where(col >= half, ls, head)
    out_ref[...] = out.astype(out_ref.dtype)


# --------------------------------------------------------------------------- #
# Param preparation (do once, not per step)
# --------------------------------------------------------------------------- #
def prepare_params(params):
    """Pad / fuse / cast params into kernel layout.

    Incoming weights are [in_features, out_features] (transpose of nn.Linear's
    .weight), biases [1, out_features].  Returns (w1, b1, w2, b2, w_head, b_head)
    with hidden padded to a multiple of 128, the two heads fused (and packed into
    a single 128-lane block when num_actions <= 64), weights in bf16, biases f32.
    """
    w1, b1, w2, b2, wm, bm, wl, bl = params
    num_inputs, hidden = w1.shape
    num_actions = wm.shape[1]
    hp = _round_up(hidden, _LANE)
    # packed layout: mean lanes [0,64), log_std lanes [64,128) when it fits.
    half = 64 if num_actions <= 64 else _round_up(num_actions, _LANE)

    w1p = jnp.zeros((num_inputs, hp), jnp.float32).at[:, :hidden].set(w1)
    b1p = jnp.zeros((1, hp), jnp.float32).at[:, :hidden].set(b1)
    w2p = jnp.zeros((hp, hp), jnp.float32).at[:hidden, :hidden].set(w2)
    b2p = jnp.zeros((1, hp), jnp.float32).at[:, :hidden].set(b2)

    whp = (jnp.zeros((hp, 2 * half), jnp.float32)
           .at[:hidden, :num_actions].set(wm)
           .at[:hidden, half:half + num_actions].set(wl))
    bhp = (jnp.zeros((1, 2 * half), jnp.float32)
           .at[:, :num_actions].set(bm)
           .at[:, half:half + num_actions].set(bl))

    return (w1p.astype(jnp.bfloat16), b1p,
            w2p.astype(jnp.bfloat16), b2p,
            whp.astype(jnp.bfloat16), bhp)


# --------------------------------------------------------------------------- #
# pallas_call wrapper
# --------------------------------------------------------------------------- #
def _choose_batch_tile(B):
    """Balanced batch tiles: minimize padding, cap at 512 rows, >=2 tiles for
    moderately large B (so v7x's 2nd TensorCore isn't idle), rows % 16 == 0."""
    n_tiles = max(1, pl.cdiv(B, _BATCH_TILE_CAP))
    if n_tiles == 1 and B >= 128:
        n_tiles = 2
    return _round_up(pl.cdiv(B, n_tiles), _ROW_ALIGN)


def _vmem_budget_bytes(tb, num_inputs, hp, out_w, single_buffer_weights):
    wbuf = 1 if single_buffer_weights else 2
    weights = wbuf * 2 * (num_inputs * hp + hp * hp + hp * out_w)     # bf16
    biases = wbuf * 4 * (2 * hp + out_w)                              # f32
    io = 2 * (tb * num_inputs * 4 + tb * out_w * 2)                   # double-buffered I/O tiles
    live = 4 * tb * (2 * hp + 2 * out_w) + 2 * tb * (hp + num_inputs)  # f32 h1/h2/head/ls + bf16 casts
    need = int((weights + biases + io + live) * 1.25) + (4 << 20)      # headroom + internal scratch
    return max(32 << 20, min(need, 112 << 20))


def _weight_spec(shape, single_buffer):
    const = lambda i: (0, 0)   # same block every grid step -> stays VMEM resident
    if single_buffer:
        return pl.BlockSpec(shape, const, pipeline_mode=pl.Buffered(1))
    return pl.BlockSpec(shape, const)


@functools.partial(jax.jit, static_argnames=("tb", "single_buffer_weights"))
def _policy_call(state, w1, b1, w2, b2, wh, bh, *, tb, single_buffer_weights):
    b_pad, num_inputs = state.shape
    hp = w1.shape[1]
    out_w = wh.shape[1]
    vmem_limit = _vmem_budget_bytes(tb, num_inputs, hp, out_w, single_buffer_weights)
    wspec = lambda s: _weight_spec(s, single_buffer_weights)

    return pl.pallas_call(
        _policy_kernel,
        out_shape=jax.ShapeDtypeStruct((b_pad, out_w), jnp.bfloat16),
        grid=(b_pad // tb,),
        in_specs=[
            pl.BlockSpec((tb, num_inputs), lambda i: (i, 0)),
            wspec(w1.shape), wspec(b1.shape),
            wspec(w2.shape), wspec(b2.shape),
            wspec(wh.shape), wspec(bh.shape),
        ],
        out_specs=pl.BlockSpec((tb, out_w), lambda i: (i, 0)),
        compiler_params=pltpu.CompilerParams(
            dimension_semantics=("parallel",),
            vmem_limit_bytes=vmem_limit),
    )(state, w1, b1, w2, b2, wh, bh)


def policy_forward(state, kparams, *, num_actions):
    """Runs PolicyNetwork.forward.  Returns (mean, log_std) in float32."""
    global _SINGLE_BUFFER_OK
    wh = kparams[4]
    half = wh.shape[1] // 2
    B = state.shape[0]

    tb = _choose_batch_tile(B)
    b_pad = _round_up(B, tb)
    if b_pad != B:
        state = jnp.pad(state, ((0, b_pad - B), (0, 0)))

    if _SINGLE_BUFFER_OK is None:
        try:
            out = _policy_call(state, *kparams, tb=tb, single_buffer_weights=True)
            jax.block_until_ready(out)
            _SINGLE_BUFFER_OK = True
        except Exception:
            _SINGLE_BUFFER_OK = False
            out = _policy_call(state, *kparams, tb=tb, single_buffer_weights=False)
    else:
        out = _policy_call(state, *kparams, tb=tb,
                           single_buffer_weights=_SINGLE_BUFFER_OK)

    mean = out[:B, :num_actions].astype(jnp.float32)
    log_std = out[:B, half:half + num_actions].astype(jnp.float32)
    return mean, log_std


# --------------------------------------------------------------------------- #
# Init + reference
# --------------------------------------------------------------------------- #
def init_policy_params(key, num_inputs, num_actions, hidden_size):
    """PyTorch-nn.Linear-style init (uniform +-1/sqrt(fan_in)); weights [in, out]."""
    def linear(k, fan_in, fan_out):
        kw, kb = jax.random.split(k)
        bound = 1.0 / jnp.sqrt(float(fan_in))
        w = jax.random.uniform(kw, (fan_in, fan_out), jnp.float32, -bound, bound)
        b = jax.random.uniform(kb, (1, fan_out), jnp.float32, -bound, bound)
        return w, b

    k1, k2, k3, k4 = jax.random.split(key, 4)
    w1, b1 = linear(k1, num_inputs, hidden_size)
    w2, b2 = linear(k2, hidden_size, hidden_size)
    wm, bm = linear(k3, hidden_size, num_actions)
    wl, bl = linear(k4, hidden_size, num_actions)
    return (w1, b1, w2, b2, wm, bm, wl, bl)


def _reference_forward(state, params):
    w1, b1, w2, b2, wm, bm, wl, bl = params
    x = jnp.maximum(state @ w1 + b1, 0.0)
    x = jnp.maximum(x @ w2 + b2, 0.0)
    mean = x @ wm + bm
    log_std = jnp.tanh(x @ wl + bl)
    log_std = LOG_STD_MIN + 0.5 * (LOG_STD_MAX - LOG_STD_MIN) * (log_std + 1.0)
    return mean, log_std


if __name__ == "__main__":
    # Small shapes consistent with the module.
    B, num_inputs, num_actions, hidden_size = 2, 16, 4, 32

    key = jax.random.PRNGKey(0)
    k_params, k_state = jax.random.split(key)
    params = init_policy_params(k_params, num_inputs, num_actions, hidden_size)
    state = jax.random.normal(k_state, (B, num_inputs), jnp.float32)

    kparams = prepare_params(params)
    mean, log_std = policy_forward(state, kparams, num_actions=num_actions)
    jax.block_until_ready((mean, log_std))

    # Sanity-check against a pure-f32 JAX reference.  bf16 MXU operands + bf16
    # output slab in the kernel -> tolerance is looser than f32-exact.
    ref_mean, ref_log_std = _reference_forward(state, params)
    assert mean.shape == (B, num_actions) and log_std.shape == (B, num_actions)
    assert jnp.allclose(mean, ref_mean, atol=5e-2, rtol=5e-2)
    assert jnp.allclose(log_std, ref_log_std, atol=5e-2, rtol=5e-2)

    print("KERNEL_OK")
</pallas_src>

<mosaic_0001>
module attributes {stable_mosaic.version = 11 : i64} {
  func.func @_policy_kernel(%arg0: i32, %arg1: memref<16x16xf32, #tpu.memory_space<vmem>>, %arg2: memref<16x128xbf16, #tpu.memory_space<vmem>>, %arg3: memref<1x128xf32, #tpu.memory_space<vmem>>, %arg4: memref<128x128xbf16, #tpu.memory_space<vmem>>, %arg5: memref<1x128xf32, #tpu.memory_space<vmem>>, %arg6: memref<128x128xbf16, #tpu.memory_space<vmem>>, %arg7: memref<1x128xf32, #tpu.memory_space<vmem>>, %arg8: memref<16x128xbf16, #tpu.memory_space<vmem>>) attributes {dimension_semantics = [#tpu.dimension_semantics<parallel>], iteration_bounds = array<i64: 1>, scalar_prefetch = 0 : i64, scratch_operands = 0 : i64, tpu.core_type = #tpu.core_type<tc>, window_params = [{transform_indices = @transform_0, window_bounds = array<i64: 16, 16>}, {pipeline_mode = #tpu.pipeline_mode<synchronous>, transform_indices = @transform_1, window_bounds = array<i64: 16, 128>}, {pipeline_mode = #tpu.pipeline_mode<synchronous>, transform_indices = @transform_2, window_bounds = array<i64: 1, 128>}, {pipeline_mode = #tpu.pipeline_mode<synchronous>, transform_indices = @transform_3, window_bounds = array<i64: 128, 128>}, {pipeline_mode = #tpu.pipeline_mode<synchronous>, transform_indices = @transform_4, window_bounds = array<i64: 1, 128>}, {pipeline_mode = #tpu.pipeline_mode<synchronous>, transform_indices = @transform_5, window_bounds = array<i64: 128, 128>}, {pipeline_mode = #tpu.pipeline_mode<synchronous>, transform_indices = @transform_6, window_bounds = array<i64: 1, 128>}, {transform_indices = @transform_7, window_bounds = array<i64: 16, 128>}]} {
    %c0 = arith.constant 0 : index
    %c0_0 = arith.constant 0 : index
    %0 = vector.load %arg1[%c0, %c0_0] : memref<16x16xf32, #tpu.memory_space<vmem>>, vector<16x16xf32>
    %1 = arith.truncf %0 : vector<16x16xf32> to vector<16x16xbf16>
    %c0_1 = arith.constant 0 : index
    %c0_2 = arith.constant 0 : index
    %2 = vector.load %arg2[%c0_1, %c0_2] : memref<16x128xbf16, #tpu.memory_space<vmem>>, vector<16x128xbf16>
    %cst = arith.constant dense<0.000000e+00> : vector<16x128xf32>
    %3 = tpu.matmul %1, %2, %cst {dimension_numbers = #tpu.dot_dimension_numbers<[1], [0], [0], [1], [0, 0, 1, 1], [], []>} : vector<16x16xbf16>, vector<16x128xbf16>, vector<16x128xf32> -> vector<16x128xf32>
    %c0_3 = arith.constant 0 : index
    %c0_4 = arith.constant 0 : index
    %4 = vector.load %arg3[%c0_3, %c0_4] : memref<1x128xf32, #tpu.memory_space<vmem>>, vector<1x128xf32>
    %5 = vector.broadcast %4 : vector<1x128xf32> to vector<16x128xf32>
    %6 = arith.addf %3, %5 : vector<16x128xf32>
    %cst_5 = arith.constant 0.000000e+00 : f32
    %7 = vector.broadcast %cst_5 : f32 to vector<16x128xf32>
    %8 = arith.maximumf %6, %7 : vector<16x128xf32>
    %9 = arith.truncf %8 : vector<16x128xf32> to vector<16x128xbf16>
    %c0_6 = arith.constant 0 : index
    %c0_7 = arith.constant 0 : index
    %10 = vector.load %arg4[%c0_6, %c0_7] : memref<128x128xbf16, #tpu.memory_space<vmem>>, vector<128x128xbf16>
    %cst_8 = arith.constant dense<0.000000e+00> : vector<16x128xf32>
    %11 = tpu.matmul %9, %10, %cst_8 {dimension_numbers = #tpu.dot_dimension_numbers<[1], [0], [0], [1], [0, 0, 1, 1], [], []>} : vector<16x128xbf16>, vector<128x128xbf16>, vector<16x128xf32> -> vector<16x128xf32>
    %c0_9 = arith.constant 0 : index
    %c0_10 = arith.constant 0 : index
    %12 = vector.load %arg5[%c0_9, %c0_10] : memref<1x128xf32, #tpu.memory_space<vmem>>, vector<1x128xf32>
    %13 = vector.broadcast %12 : vector<1x128xf32> to vector<16x128xf32>
    %14 = arith.addf %11, %13 : vector<16x128xf32>
    %cst_11 = arith.constant 0.000000e+00 : f32
    %15 = vector.broadcast %cst_11 : f32 to vector<16x128xf32>
    %16 = arith.maximumf %14, %15 : vector<16x128xf32>
    %17 = arith.truncf %16 : vector<16x128xf32> to vector<16x128xbf16>
    %c0_12 = arith.constant 0 : index
    %c0_13 = arith.constant 0 : index
    %18 = vector.load %arg6[%c0_12, %c0_13] : memref<128x128xbf16, #tpu.memory_space<vmem>>, vector<128x128xbf16>
    %cst_14 = arith.constant dense<0.000000e+00> : vector<16x128xf32>
    %19 = tpu.matmul %17, %18, %cst_14 {dimension_numbers = #tpu.dot_dimension_numbers<[1], [0], [0], [1], [0, 0, 1, 1], [], []>} : vector<16x128xbf16>, vector<128x128xbf16>, vector<16x128xf32> -> vector<16x128xf32>
    %c0_15 = arith.constant 0 : index
    %c0_16 = arith.constant 0 : index
    %20 = vector.load %arg7[%c0_15, %c0_16] : memref<1x128xf32, #tpu.memory_space<vmem>>, vector<1x128xf32>
    %21 = vector.broadcast %20 : vector<1x128xf32> to vector<16x128xf32>
    %22 = arith.addf %19, %21 : vector<16x128xf32>
    %23 = math.tanh %22 : vector<16x128xf32>
    %cst_17 = arith.constant 1.000000e+00 : f32
    %24 = vector.broadcast %cst_17 : f32 to vector<16x128xf32>
    %25 = arith.addf %23, %24 : vector<16x128xf32>
    %cst_18 = arith.constant 2.550000e+00 : f32
    %26 = vector.broadcast %cst_18 : f32 to vector<16x128xf32>
    %27 = arith.mulf %26, %25 : vector<16x128xf32>
    %cst_19 = arith.constant -5.000000e+00 : f32
    %28 = vector.broadcast %cst_19 : f32 to vector<16x128xf32>
    %29 = arith.addf %28, %27 : vector<16x128xf32>
    %30 = tpu.iota {dimensions = array<i32: 1>} : vector<16x128xi32>
    %c64_i32 = arith.constant 64 : i32
    %31 = vector.broadcast %c64_i32 : i32 to vector<16x128xi32>
    %32 = arith.cmpi sge, %30, %31 : vector<16x128xi32>
    %33 = arith.select %32, %29, %22 : vector<16x128xi1>, vector<16x128xf32>
    %34 = arith.truncf %33 : vector<16x128xf32> to vector<16x128xbf16>
    %c0_20 = arith.constant 0 : index
    %c0_21 = arith.constant 0 : index
    %35 = vector.load %arg8[%c0_20, %c0_21] : memref<16x128xbf16, #tpu.memory_space<vmem>>, vector<16x128xbf16>
    tpu.vector_store %arg8[%c0_20, %c0_21], %34 {strides = array<i32>} : memref<16x128xbf16, #tpu.memory_space<vmem>>, vector<16x128xbf16>,
    return
  }
  func.func @transform_0(%arg0: i32) -> (i32, i32) {
    %c0_i32 = arith.constant 0 : i32
    %c0_i32_0 = arith.constant 0 : i32
    return %arg0, %c0_i32 : i32, i32
  }
  func.func @transform_1(%arg0: i32) -> (i32, i32) {
    %c0_i32 = arith.constant 0 : i32
    %c0_i32_0 = arith.constant 0 : i32
    %c0_i32_1 = arith.constant 0 : i32
    return %c0_i32, %c0_i32_0 : i32, i32
  }
  func.func @transform_2(%arg0: i32) -> (i32, i32) {
    %c0_i32 = arith.constant 0 : i32
    %c0_i32_0 = arith.constant 0 : i32
    %c0_i32_1 = arith.constant 0 : i32
    return %c0_i32, %c0_i32_0 : i32, i32
  }
  func.func @transform_3(%arg0: i32) -> (i32, i32) {
    %c0_i32 = arith.constant 0 : i32
    %c0_i32_0 = arith.constant 0 : i32
    %c0_i32_1 = arith.constant 0 : i32
    return %c0_i32, %c0_i32_0 : i32, i32
  }
  func.func @transform_4(%arg0: i32) -> (i32, i32) {
    %c0_i32 = arith.constant 0 : i32
    %c0_i32_0 = arith.constant 0 : i32
    %c0_i32_1 = arith.constant 0 : i32
    return %c0_i32, %c0_i32_0 : i32, i32
  }
  func.func @transform_5(%arg0: i32) -> (i32, i32) {
    %c0_i32 = arith.constant 0 : i32
    %c0_i32_0 = arith.constant 0 : i32
    %c0_i32_1 = arith.constant 0 : i32
    return %c0_i32, %c0_i32_0 : i32, i32
  }
  func.func @transform_6(%arg0: i32) -> (i32, i32) {
    %c0_i32 = arith.constant 0 : i32
    %c0_i32_0 = arith.constant 0 : i32
    %c0_i32_1 = arith.constant 0 : i32
    return %c0_i32, %c0_i32_0 : i32, i32
  }
  func.func @transform_7(%arg0: i32) -> (i32, i32) {
    %c0_i32 = arith.constant 0 : i32
    %c0_i32_0 = arith.constant 0 : i32
    return %arg0, %c0_i32 : i32, i32
  }
}

module attributes {stable_mosaic.version = 11 : i64} {
  func.func @_policy_kernel(%arg0: i32, %arg1: memref<16x16xf32, #tpu.memory_space<vmem>>, %arg2: memref<16x128xbf16, #tpu.memory_space<vmem>>, %arg3: memref<1x128xf32, #tpu.memory_space<vmem>>, %arg4: memref<128x128xbf16, #tpu.memory_space<vmem>>, %arg5: memref<1x128xf32, #tpu.memory_space<vmem>>, %arg6: memref<128x128xbf16, #tpu.memory_space<vmem>>, %arg7: memref<1x128xf32, #tpu.memory_space<vmem>>, %arg8: memref<16x128xbf16, #tpu.memory_space<vmem>>) attributes {dimension_semantics = [#tpu.dimension_semantics<parallel>], iteration_bounds = array<i64: 1>, scalar_prefetch = 0 : i64, scratch_operands = 0 : i64, tpu.core_type = #tpu.core_type<tc>, window_params = [{transform_indices = @transform_0, window_bounds = array<i64: 16, 16>}, {pipeline_mode = #tpu.pipeline_mode<synchronous>, transform_indices = @transform_1, window_bounds = array<i64: 16, 128>}, {pipeline_mode = #tpu.pipeline_mode<synchronous>, transform_indices = @transform_2, window_bounds = array<i64: 1, 128>}, {pipeline_mode = #tpu.pipeline_mode<synchronous>, transform_indices = @transform_3, window_bounds = array<i64: 128, 128>}, {pipeline_mode = #tpu.pipeline_mode<synchronous>, transform_indices = @transform_4, window_bounds = array<i64: 1, 128>}, {pipeline_mode = #tpu.pipeline_mode<synchronous>, transform_indices = @transform_5, window_bounds = array<i64: 128, 128>}, {pipeline_mode = #tpu.pipeline_mode<synchronous>, transform_indices = @transform_6, window_bounds = array<i64: 1, 128>}, {transform_indices = @transform_7, window_bounds = array<i64: 16, 128>}]} {
    %c0 = arith.constant 0 : index
    %c0_0 = arith.constant 0 : index
    %0 = vector.load %arg1[%c0, %c0_0] : memref<16x16xf32, #tpu.memory_space<vmem>>, vector<16x16xf32>
    %1 = arith.truncf %0 : vector<16x16xf32> to vector<16x16xbf16>
    %c0_1 = arith.constant 0 : index
    %c0_2 = arith.constant 0 : index
    %2 = vector.load %arg2[%c0_1, %c0_2] : memref<16x128xbf16, #tpu.memory_space<vmem>>, vector<16x128xbf16>
    %cst = arith.constant dense<0.000000e+00> : vector<16x128xf32>
    %3 = tpu.matmul %1, %2, %cst {dimension_numbers = #tpu.dot_dimension_numbers<[1], [0], [0], [1], [0, 0, 1, 1], [], []>} : vector<16x16xbf16>, vector<16x128xbf16>, vector<16x128xf32> -> vector<16x128xf32>
    %c0_3 = arith.constant 0 : index
    %c0_4 = arith.constant 0 : index
    %4 = vector.load %arg3[%c0_3, %c0_4] : memref<1x128xf32, #tpu.memory_space<vmem>>, vector<1x128xf32>
    %5 = vector.broadcast %4 : vector<1x128xf32> to vector<16x128xf32>
    %6 = arith.addf %3, %5 : vector<16x128xf32>
    %cst_5 = arith.constant 0.000000e+00 : f32
    %7 = vector.broadcast %cst_5 : f32 to vector<16x128xf32>
    %8 = arith.maximumf %6, %7 : vector<16x128xf32>
    %9 = arith.truncf %8 : vector<16x128xf32> to vector<16x128xbf16>
    %c0_6 = arith.constant 0 : index
    %c0_7 = arith.constant 0 : index
    %10 = vector.load %arg4[%c0_6, %c0_7] : memref<128x128xbf16, #tpu.memory_space<vmem>>, vector<128x128xbf16>
    %cst_8 = arith.constant dense<0.000000e+00> : vector<16x128xf32>
    %11 = tpu.matmul %9, %10, %cst_8 {dimension_numbers = #tpu.dot_dimension_numbers<[1], [0], [0], [1], [0, 0, 1, 1], [], []>} : vector<16x128xbf16>, vector<128x128xbf16>, vector<16x128xf32> -> vector<16x128xf32>
    %c0_9 = arith.constant 0 : index
    %c0_10 = arith.constant 0 : index
    %12 = vector.load %arg5[%c0_9, %c0_10] : memref<1x128xf32, #tpu.memory_space<vmem>>, vector<1x128xf32>
    %13 = vector.broadcast %12 : vector<1x128xf32> to vector<16x128xf32>
    %14 = arith.addf %11, %13 : vector<16x128xf32>
    %cst_11 = arith.constant 0.000000e+00 : f32
    %15 = vector.broadcast %cst_11 : f32 to vector<16x128xf32>
    %16 = arith.maximumf %14, %15 : vector<16x128xf32>
    %17 = arith.truncf %16 : vector<16x128xf32> to vector<16x128xbf16>
    %c0_12 = arith.constant 0 : index
    %c0_13 = arith.constant 0 : index
    %18 = vector.load %arg6[%c0_12, %c0_13] : memref<128x128xbf16, #tpu.memory_space<vmem>>, vector<128x128xbf16>
    %cst_14 = arith.constant dense<0.000000e+00> : vector<16x128xf32>
    %19 = tpu.matmul %17, %18, %cst_14 {dimension_numbers = #tpu.dot_dimension_numbers<[1], [0], [0], [1], [0, 0, 1, 1], [], []>} : vector<16x128xbf16>, vector<128x128xbf16>, vector<16x128xf32> -> vector<16x128xf32>
    %c0_15 = arith.constant 0 : index
    %c0_16 = arith.constant 0 : index
    %20 = vector.load %arg7[%c0_15, %c0_16] : memref<1x128xf32, #tpu.memory_space<vmem>>, vector<1x128xf32>
    %21 = vector.broadcast %20 : vector<1x128xf32> to vector<16x128xf32>
    %22 = arith.addf %19, %21 : vector<16x128xf32>
    %23 = math.tanh %22 : vector<16x128xf32>
    %cst_17 = arith.constant 1.000000e+00 : f32
    %24 = vector.broadcast %cst_17 : f32 to vector<16x128xf32>
    %25 = arith.addf %23, %24 : vector<16x128xf32>
    %cst_18 = arith.constant 2.550000e+00 : f32
    %26 = vector.broadcast %cst_18 : f32 to vector<16x128xf32>
    %27 = arith.mulf %26, %25 : vector<16x128xf32>
    %cst_19 = arith.constant -5.000000e+00 : f32
    %28 = vector.broadcast %cst_19 : f32 to vector<16x128xf32>
    %29 = arith.addf %28, %27 : vector<16x128xf32>
    %30 = tpu.iota {dimensions = array<i32: 1>} : vector<16x128xi32>
    %c64_i32 = arith.constant 64 : i32
    %31 = vector.broadcast %c64_i32 : i32 to vector<16x128xi32>
    %32 = arith.cmpi sge, %30, %31 : vector<16x128xi32>
    %33 = arith.select %32, %29, %22 : vector<16x128xi1>, vector<16x128xf32>
    %34 = arith.truncf %33 : vector<16x128xf32> to vector<16x128xbf16>
    %c0_20 = arith.constant 0 : index
    %c0_21 = arith.constant 0 : index
    %35 = vector.load %arg8[%c0_20, %c0_21] : memref<16x128xbf16, #tpu.memory_space<vmem>>, vector<16x128xbf16>
    tpu.vector_store %arg8[%c0_20, %c0_21], %34 {strides = array<i32>} : memref<16x128xbf16, #tpu.memory_space<vmem>>, vector<16x128xbf16>,
    return
  }
  func.func @transform_0(%arg0: i32) -> (i32, i32) {
    %c0_i32 = arith.constant 0 : i32
    %c0_i32_0 = arith.constant 0 : i32
    return %arg0, %c0_i32 : i32, i32
  }
  func.func @transform_1(%arg0: i32) -> (i32, i32) {
    %c0_i32 = arith.constant 0 : i32
    %c0_i32_0 = arith.constant 0 : i32
    %c0_i32_1 = arith.constant 0 : i32
    return %c0_i32, %c0_i32_0 : i32, i32
  }
  func.func @transform_2(%arg0: i32) -> (i32, i32) {
    %c0_i32 = arith.constant 0 : i32
    %c0_i32_0 = arith.constant 0 : i32
    %c0_i32_1 = arith.constant 0 : i32
    return %c0_i32, %c0_i32_0 : i32, i32
  }
  func.func @transform_3(%arg0: i32) -> (i32, i32) {
    %c0_i32 = arith.constant 0 : i32
    %c0_i32_0 = arith.constant 0 : i32
    %c0_i32_1 = arith.constant 0 : i32
    return %c0_i32, %c0_i32_0 : i32, i32
  }
  func.func @transform_4(%arg0: i32) -> (i32, i32) {
    %c0_i32 = arith.constant 0 : i32
    %c0_i32_0 = arith.constant 0 : i32
    %c0_i32_1 = arith.constant 0 : i32
    return %c0_i32, %c0_i32_0 : i32, i32
  }
  func.func @transform_5(%arg0: i32) -> (i32, i32) {
    %c0_i32 = arith.constant 0 : i32
    %c0_i32_0 = arith.constant 0 : i32
    %c0_i32_1 = arith.constant 0 : i32
    return %c0_i32, %c0_i32_0 : i32, i32
  }
  func.func @transform_6(%arg0: i32) -> (i32, i32) {
    %c0_i32 = arith.constant 0 : i32
    %c0_i32_0 = arith.constant 0 : i32
    %c0_i32_1 = arith.constant 0 : i32
    return %c0_i32, %c0_i32_0 : i32, i32
  }
  func.func @transform_7(%arg0: i32) -> (i32, i32) {
    %c0_i32 = arith.constant 0 : i32
    %c0_i32_0 = arith.constant 0 : i32
    return %arg0, %c0_i32 : i32, i32
  }
}

</mosaic_0001>

<bundles_post_ra>
// kernel: _policy_call.1
= control target key start
LH: loop header
LB: loop body
LE: loop exit
PB: predicated region body
PF: predicated region fallthrough
CT: control target
= control target key end

     0   :  { %12 = vsyncpa [#allocation3], 0  ;;  %s826_s0 = inlined_call_operand.hbm [shape: f32[16,16], index: 0, kind: input, shape index: {}]   ;;  %s827_s1 = inlined_call_operand.hbm [shape: bf16[16,128], index: 1, kind: input, shape index: {}]   ;;  %s828_s2 = inlined_call_operand.vmem [shape: f32[1,128], index: 2, kind: input, shape index: {}]   ;;  %s829_s3 = inlined_call_operand.hbm [shape: bf16[128,128], index: 3, kind: input, shape index: {}]   ;;  %s830_s4 = inlined_call_operand.vmem [shape: f32[1,128], index: 4, kind: input, shape index: {}]   ;;  %s831_s5 = inlined_call_operand.hbm [shape: bf16[128,128], index: 5, kind: input, shape index: {}]   ;;  %s832_s6 = inlined_call_operand.vmem [shape: f32[1,128], index: 6, kind: input, shape index: {}]   ;;  %s833_s7 = inlined_call_operand.hbm [shape: bf16[16,128], index: 7, kind: output, shape index: {}]  }
   0x1   :  { %13 = vsyncpa [#allocation6], 0 }
   0x2   :  { %14 = vsyncpa [#allocation9], 0 }
   0x3   :  { %15 = vsyncpa [#allocation4], 0  ;;  %s664_s24 = smov [#allocation5]   ;;  %s546_s28 = scalar_lea.hbm %s827_s1, 128 }
   0x4   :  { %s33_s25 = sshll.u32 %s664_s24, 4  ;;  %p547_p0 = scmp.ne.s32.totalorder %s827_s1, %s546_s28  ;;  %s34_s25 = int_to_ptr.vmem [resolvable:$true] %s33_s25 }
   0x5   :  { %p550_p1 = scmp.lt.u32.totalorder %s546_s28, %s827_s1 }
   0x7   :  { %p552_p2 = pnand %p550_p1, %p547_p0 }
   0x9   :  { %555 = shalt.err (!%p552_p2)
}
   0xa   :  { %s556_s10 = scalar_lea.vmem %s34_s25, 128  ;;  %p561_p4 = scmp.lt.s32.totalorder %s34_s25, %s34_s25 }
   0xb   :  { %p557_p3 = scmp.ne.s32.totalorder %s34_s25, %s556_s10  ;;  %p562_p5 = scmp.lt.s32.totalorder %s556_s10, %s556_s10 }
   0xd   :  { %p563_p6 = por %p562_p5, %p561_p4 }
   0xf   :  { %p564_p7 = pnand %p563_p6, %p557_p3 }
  0x11   :  { %567 = shalt.err (!%p564_p7)
}
  0x12   :  { %s665_s11 = smov 64   ;;  %s666_s12 = smov 4  }
  0x13   :  { %39 = dma.hbm_to_vmem [thread:$0]  %s827_s1, 128, %s34_s25, [#allocation6], %s665_s11, %s665_s11, %s666_s12  }
  0x14   :  { %s667_s15 = smov [#allocation2]   ;;  %s568_s19 = scalar_lea.hbm %s826_s0, 256 }
  0x15   :  { %s21_s16 = sshll.u32 %s667_s15, 4  ;;  %p569_p8 = scmp.ne.s32.totalorder %s826_s0, %s568_s19  ;;  %s22_s16 = int_to_ptr.vmem [resolvable:$true] %s21_s16 }
  0x16   :  { %p572_p9 = scmp.lt.u32.totalorder %s568_s19, %s826_s0 }
  0x18   :  { %p574_p10 = pnand %p572_p9, %p569_p8 }
  0x1a   :  { %577 = shalt.err (!%p574_p10)
}
  0x1b   :  { %s578_s24 = scalar_lea.vmem %s22_s16, 256  ;;  %p583_p12 = scmp.lt.s32.totalorder %s22_s16, %s22_s16 }
  0x1c   :  { %p579_p11 = scmp.ne.s32.totalorder %s22_s16, %s578_s24  ;;  %p584_p13 = scmp.lt.s32.totalorder %s578_s24, %s578_s24 }
  0x1e   :  { %p585_p0 = por %p584_p13, %p583_p12 }
  0x20   :  { %p586_p1 = pnand %p585_p0, %p579_p11 }
  0x22   :  { %589 = shalt.err (!%p586_p1)
}
  0x23   :  { %s668_s1 = smov 128   ;;  %s669_s25 = smov 8  }
  0x24   :  { %27 = dma.hbm_to_vmem [thread:$0]  %s826_s0, 256, %s22_s16, [#allocation3], %s668_s1, %s668_s1, %s669_s25  }
  0x25   :  { %s670_s28 = smov [#allocation7]   ;;  %s671_s30 = smov [#allocation8]  }
  0x26   :  { %s47_s29 = sshll.u32 %s670_s28, 4  ;;  %s61_s8 = sshll.u32 %s671_s30, 4  ;;  %s48_s29 = int_to_ptr.vmem [resolvable:$true] %s47_s29  ;;  %s742_s8 = int_to_ptr.vmem [resolvable:$true] %s61_s8 }
  0x27   :  { %s590_s13 = scalar_lea.hbm %s829_s3, 1024 }
  0x28   :  { %p591_p2 = scmp.ne.s32.totalorder %s829_s3, %s590_s13  ;;  %p594_p3 = scmp.lt.u32.totalorder %s590_s13, %s829_s3 }
  0x2a   :  { %p596_p4 = pnand %p594_p3, %p591_p2 }
  0x2c   :  { %599 = shalt.err (!%p596_p4)
}
  0x2d   :  { %s600_s0 = scalar_lea.vmem %s48_s29, 1024  ;;  %p605_p6 = scmp.lt.s32.totalorder %s48_s29, %s48_s29 }
  0x2e   :  { %p601_p5 = scmp.ne.s32.totalorder %s48_s29, %s600_s0  ;;  %p606_p7 = scmp.lt.s32.totalorder %s600_s0, %s600_s0 }
  0x30   :  { %p607_p8 = por %p606_p7, %p605_p6 }
  0x32   :  { %p608_p9 = pnand %p607_p8, %p601_p5 }
  0x34   :  { %611 = shalt.err (!%p608_p9)
}
  0x35   :  { %53 = dma.hbm_to_vmem [thread:$0]  %s829_s3, 1024, %s48_s29, [#allocation6], %s665_s11, %s665_s11, %s666_s12  }
  0x36   :  { %s612_s22 = scalar_lea.hbm %s831_s5, 1024 }
  0x37   :  { %p613_p10 = scmp.ne.s32.totalorder %s831_s5, %s612_s22  ;;  %p616_p11 = scmp.lt.u32.totalorder %s612_s22, %s831_s5 }
  0x39   :  { %p618_p12 = pnand %p616_p11, %p613_p10 }
  0x3b   :  { %621 = shalt.err (!%p618_p12)
}
  0x3c   :  { %s622_s26 = scalar_lea.vmem %s742_s8, 1024  ;;  %p627_p0 = scmp.lt.s32.totalorder %s742_s8, %s742_s8 }
  0x3d   :  { %p623_p13 = scmp.ne.s32.totalorder %s742_s8, %s622_s26  ;;  %p628_p1 = scmp.lt.s32.totalorder %s622_s26, %s622_s26 }
  0x3f   :  { %p629_p2 = por %p628_p1, %p627_p0 }
  0x41   :  { %p630_p3 = pnand %p629_p2, %p623_p13 }
  0x43   :  { %633 = shalt.err (!%p630_p3)
}
  0x44   :  { %67 = dma.hbm_to_vmem [thread:$0]  %s831_s5, 1024, %s742_s8, [#allocation9], %s665_s11, %s665_s11, %s666_s12  }
  0x45   :  { %656 = dma.done.wait [#allocation3], 256  }
  0x46   :  { %657 = vsyncadd [#allocation3], 4294967040 }
  0x47   :  { %658 = dma.done.wait [#allocation6], 1152  }
  0x48   :  { %659 = vsyncadd [#allocation6], 4294966144 }
  0x49   :  { %660 = dma.done.wait [#allocation9], 1024  }
  0x4a   :  { %661 = vsyncadd [#allocation9], 4294966272  ;;  %v672_v0 = vmov 0.0   ;;  %vm673_vm0 = vmmov 0   ;;  %v525_v1 = vld [vmem:[#allocation5] sm:$0xff]   ;;  %v83_v2 = vld [vmem:[#allocation2] sm:$0xff]  ;;  %v384_v48 = vlaneseq }
  0x4b   :  { %468 = vmatprep.subr.bf16.mxu0 %v672_v0  ;;  %470 = vmatprep.mubr.msk.bf16.mxu0 %vm673_vm0, %v672_v0  ;;  %v84_v3 = vld [vmem:[#allocation2 + $0x8] sm:$0xff]  ;;  %vm101_vm1 = vcmask 130048   ;;  %v526_v5 = vld [vmem:[#allocation7] sm:$0xff]   ;;  %v527_v6 = vld [vmem:[#allocation7 + $0x8] sm:$0xff]  }
  0x4c   :  { %474 = vmatprep.subr.bf16.mxu1 %v672_v0  ;;  %490 = vmatprep.mubr.msk.bf16.mxu1 %vm673_vm0, %v672_v0  ;;  %v85_v4 = vpack.c.bf16 %v84_v3, %v83_v2  ;;  %v528_v7 = vld [vmem:[#allocation7 + $0x10] sm:$0xff]   ;;  %v529_v8 = vld [vmem:[#allocation7 + $0x18] sm:$0xff]   ;;  %v530_v9 = vld [vmem:[#allocation7 + $0x20] sm:$0xff]   ;;  %v385_v52 = vand.u32 127, %v384_v48 }
  0x4d   :  { %469 = vmatpush3.bf16.msra.mxu0 %v525_v1  ;;  %475 = vmatpush3.bf16.msra.mxu1 %v526_v5  ;;  %v531_v10 = vld [vmem:[#allocation7 + $0x28] sm:$0xff]   ;;  %v532_v11 = vld [vmem:[#allocation7 + $0x30] sm:$0xff]   ;;  %v533_v12 = vld [vmem:[#allocation7 + $0x38] sm:$0xff]  }
  0x4e   :  { %494 = vmatprep.subr.bf16.mxu0 %v672_v0  ;;  %476 = vmatprep.subr.bf16.mxu1 %v672_v0  ;;  %v534_v13 = vld [vmem:[#allocation8] sm:$0xff]   ;;  %v535_v14 = vld [vmem:[#allocation8 + $0x8] sm:$0xff]   ;;  %v536_v15 = vld [vmem:[#allocation8 + $0x10] sm:$0xff]   ;;  %vm386_vm2 = vcmp.ge.s32.totalorder %v385_v52, 64 }
  0x4f   :  { %v537_v16 = vld [vmem:[#allocation8 + $0x18] sm:$0xff]   ;;  %v538_v17 = vld [vmem:[#allocation8 + $0x20] sm:$0xff]   ;;  %v539_v18 = vld [vmem:[#allocation8 + $0x28] sm:$0xff]  }
  0x50   :  { %471 = vmatmul.mubr.msk.bf16.vlgmr.msra.gmra.mrb[0].mxu0 %vm101_vm1, %v85_v4  ;;  %v418_v19 = vld [vmem:[%s828_s2] ss:$0 sm:$0xff]  ;;  %v540_v29 = vld [vmem:[#allocation8 + $0x30] sm:$0xff]   ;;  %v541_v30 = vld [vmem:[#allocation8 + $0x38] sm:$0xff]  }
  0x51   :  { %510 = vmatprep.mubr.msk.bf16.mxu0 %vm673_vm0, %v672_v0  ;;  %477 = vmatpush3.bf16.msra.mxu1 %v527_v6  ;;  %v421_v31 = vld [vmem:[%s830_s4] ss:$0 sm:$0xff]  ;;  %s674_s4 = smov [#allocation10]  }
  0x52   :  { %478 = vmatprep.subr.bf16.mxu1 %v672_v0  ;;  %495 = vmatpush3.bf16.msra.mxu0 %v534_v13  ;;  %v430_v41 = vld [vmem:[%s832_s6] ss:$0 sm:$0xff]  ;;  %s404_s6 = sshll.u32 %s674_s4, 4  ;;  %s405_s6 = int_to_ptr.vmem [resolvable:$true] %s404_s6 }
  0x53   :  { %496 = vmatprep.subr.bf16.mxu0 %v672_v0  ;;  %s634_s9 = scalar_lea.vmem %s405_s6, 128  ;;  %p639_p5 = scmp.lt.s32.totalorder %s405_s6, %s405_s6 }
  0x54   :  { %p635_p4 = scmp.ne.s32.totalorder %s405_s6, %s634_s9  ;;  %p640_p6 = scmp.lt.s32.totalorder %s634_s9, %s634_s9 }
  0x55   :  { %479 = vmatpush3.bf16.msra.mxu1 %v528_v7 }
  0x56   :  { %480 = vmatprep.subr.bf16.mxu1 %v672_v0  ;;  %497 = vmatpush3.bf16.msra.mxu0 %v535_v14  ;;  %p641_p7 = por %p640_p6, %p639_p5 }
  0x57   :  { %498 = vmatprep.subr.bf16.mxu0 %v672_v0 }
  0x58   :  { %p642_p8 = pnand %p641_p7, %p635_p4 }
  0x59   :  { %481 = vmatpush3.bf16.msra.mxu1 %v529_v8 }
  0x5a   :  { %482 = vmatprep.subr.bf16.mxu1 %v672_v0  ;;  %499 = vmatpush3.bf16.msra.mxu0 %v536_v15 }
  0x5b   :  { %500 = vmatprep.subr.bf16.mxu0 %v672_v0 }
  0x5d   :  { %483 = vmatpush3.bf16.msra.mxu1 %v530_v9 }
  0x5e   :  { %484 = vmatprep.subr.bf16.mxu1 %v672_v0  ;;  %501 = vmatpush3.bf16.msra.mxu0 %v537_v16 }
  0x5f   :  { %502 = vmatprep.subr.bf16.mxu0 %v672_v0 }
  0x61   :  { %485 = vmatpush3.bf16.msra.mxu1 %v531_v10 }
  0x62   :  { %486 = vmatprep.subr.bf16.mxu1 %v672_v0  ;;  %503 = vmatpush3.bf16.msra.mxu0 %v538_v17 }
  0x63   :  { %504 = vmatprep.subr.bf16.mxu0 %v672_v0 }
  0x65   :  { %487 = vmatpush3.bf16.msra.mxu1 %v532_v11 }
  0x66   :  { %488 = vmatprep.subr.bf16.mxu1 %v672_v0  ;;  %505 = vmatpush3.bf16.msra.mxu0 %v539_v18 }
  0x67   :  { %506 = vmatprep.subr.bf16.mxu0 %v672_v0 }
  0x69   :  { %489 = vmatpush3.bf16.msra.mxu1 %v533_v12 }
  0x6a   :  { %507 = vmatpush3.bf16.msra.mxu0 %v540_v29 }
  0x6b   :  { %508 = vmatprep.subr.bf16.mxu0 %v672_v0 }
  0x6e   :  { %509 = vmatpush3.bf16.msra.mxu0 %v541_v30 }
 0x123   :  { %v139_v20 = vpop.f32.mrb[0].mxu0 }
 0x124   :  { %v140_v21 = vadd.f32 %v418_v19, %v139_v20  ;;  %v472_v22 = vpop.f32.mrb[1].mxu0 }
 0x125   :  { %v142_v23 = vpop.f32.mrb[2].mxu0 }
 0x126   :  { %v143_v24 = vadd.f32 %v418_v19, %v142_v23  ;;  %v473_v25 = vpop.f32.mrb[3].mxu0  ;;  %v146_v26 = vmax.f32 %v140_v21, 0.0 }
 0x128   :  { %v147_v27 = vmax.f32 %v143_v24, 0.0 }
 0x12a   :  { %v148_v28 = vpack.c.bf16 %v147_v27, %v146_v26 }
 0x12c   :  { %491 = vmatmul.mubr.bf16.vlgmr.msra.gmra.mrb[0].mxu1 %v148_v28 }
 0x1ff   :  { %v254_v32 = vpop.f32.mrb[0].mxu1 }
 0x200   :  { %v255_v33 = vadd.f32 %v421_v31, %v254_v32  ;;  %v492_v34 = vpop.f32.mrb[1].mxu1 }
 0x201   :  { %v257_v35 = vpop.f32.mrb[2].mxu1 }
 0x202   :  { %v258_v36 = vadd.f32 %v421_v31, %v257_v35  ;;  %v493_v37 = vpop.f32.mrb[3].mxu1  ;;  %v261_v38 = vmax.f32 %v255_v33, 0.0 }
 0x204   :  { %v262_v39 = vmax.f32 %v258_v36, 0.0 }
 0x206   :  { %v263_v40 = vpack.c.bf16 %v262_v39, %v261_v38 }
 0x208   :  { %511 = vmatmul.mubr.bf16.vlgmr.msra.gmra.mrb[4].mxu0 %v263_v40 }
 0x2db   :  { %v369_v42 = vpop.f32.mrb[4].mxu0 }
 0x2dc   :  { %v370_v43 = vadd.f32 %v430_v41, %v369_v42  ;;  %v512_v44 = vpop.f32.mrb[5].mxu0 }
 0x2dd   :  { %v372_v45 = vpop.f32.mrb[6].mxu0 }
 0x2de   :  { %542 = vtanh.f32 %v370_v43  ;;  %v373_v46 = vadd.f32 %v430_v41, %v372_v45  ;;  %v513_v47 = vpop.f32.mrb[7].mxu0 }
 0x2e0   :  { %544 = vtanh.f32 %v373_v46 }
 0x2e8   :  { %v543_v49 = vpop.eup %542 }
 0x2e9   :  { %v378_v50 = vadd.f32 1.0, %v543_v49 }
 0x2ea   :  { %v545_v51 = vpop.eup %544 }
 0x2eb   :  { %v380_v53 = vmul.f32 2.55, %v378_v50  ;;  %v379_v54 = vadd.f32 1.0, %v545_v51 }
 0x2ed   :  { %v382_v55 = vadd.f32 -5.0, %v380_v53  ;;  %v381_v56 = vmul.f32 2.55, %v379_v54 }
 0x2ef   :  { %v383_v57 = vadd.f32 -5.0, %v381_v56  ;;  %v387_v58 = vsel %vm386_vm2, %v382_v55, %v370_v43 }
 0x2f1   :  { %v388_v59 = vsel %vm386_vm2, %v383_v57, %v373_v46 }
 0x2f2   :  { %v446_v60 = vpack.c.bf16 %v388_v59, %v387_v58 }
 0x2f4   :  { %447 = vst [vmem:[#allocation10] sm:$0xff] %v446_v60  }
 0x2f5   :  { %645 = shalt.err (!%p642_p8)
}
 0x2f6   :  { %s646_s14 = scalar_lea.hbm %s833_s7, 128 }
 0x2f7   :  { %p647_p9 = scmp.ne.s32.totalorder %s833_s7, %s646_s14  ;;  %p650_p10 = scmp.lt.u32.totalorder %s646_s14, %s833_s7 }
 0x2f9   :  { %p652_p11 = pnand %p650_p10, %p647_p9 }
 0x2fb   :  { %655 = shalt.err (!%p652_p11)
}
 0x2fc   :  { %410 = dma.vmem_to_hbm [thread:$0]  %s405_s6, 128, %s833_s7, [#allocation4], %s665_s11, %s665_s11, %s666_s12  }
 0x2fd   :  { %662 = dma.done.wait [#allocation4], 128  }
 0x2fe   :  { %663 = vsyncadd [#allocation4], 4294967168 }
 0x2ff   :  { %414 = vsyncpa [#allocation3], 1 }
 0x300   :  { %415 = vsyncpa [#allocation6], 1 }
 0x301   :  { %416 = vsyncpa [#allocation9], 1 }
 0x302   :  { %417 = vsyncpa [#allocation4], 1 }

// kernel: _policy_call.1
= control target key start
LH: loop header
LB: loop body
LE: loop exit
PB: predicated region body
PF: predicated region fallthrough
CT: control target
= control target key end

     0   :  { %12 = vsyncpa [#allocation3], 0  ;;  %s826_s0 = inlined_call_operand.hbm [shape: f32[16,16], index: 0, kind: input, shape index: {}]   ;;  %s827_s1 = inlined_call_operand.hbm [shape: bf16[16,128], index: 1, kind: input, shape index: {}]   ;;  %s828_s2 = inlined_call_operand.vmem [shape: f32[1,128], index: 2, kind: input, shape index: {}]   ;;  %s829_s3 = inlined_call_operand.hbm [shape: bf16[128,128], index: 3, kind: input, shape index: {}]   ;;  %s830_s4 = inlined_call_operand.vmem [shape: f32[1,128], index: 4, kind: input, shape index: {}]   ;;  %s831_s5 = inlined_call_operand.hbm [shape: bf16[128,128], index: 5, kind: input, shape index: {}]   ;;  %s832_s6 = inlined_call_operand.vmem [shape: f32[1,128], index: 6, kind: input, shape index: {}]   ;;  %s833_s7 = inlined_call_operand.hbm [shape: bf16[16,128], index: 7, kind: output, shape index: {}]  }
   0x1   :  { %13 = vsyncpa [#allocation6], 0 }
   0x2   :  { %14 = vsyncpa [#allocation9], 0 }
   0x3   :  { %15 = vsyncpa [#allocation4], 0  ;;  %s664_s24 = smov [#allocation5]   ;;  %s546_s28 = scalar_lea.hbm %s827_s1, 128 }
   0x4   :  { %s33_s25 = sshll.u32 %s664_s24, 4  ;;  %p547_p0 = scmp.ne.s32.totalorder %s827_s1, %s546_s28  ;;  %s34_s25 = int_to_ptr.vmem [resolvable:$true] %s33_s25 }
   0x5   :  { %p550_p1 = scmp.lt.u32.totalorder %s546_s28, %s827_s1 }
   0x7   :  { %p552_p2 = pnand %p550_p1, %p547_p0 }
   0x9   :  { %555 = shalt.err (!%p552_p2)
}
   0xa   :  { %s556_s10 = scalar_lea.vmem %s34_s25, 128  ;;  %p561_p4 = scmp.lt.s32.totalorder %s34_s25, %s34_s25 }
   0xb   :  { %p557_p3 = scmp.ne.s32.totalorder %s34_s25, %s556_s10  ;;  %p562_p5 = scmp.lt.s32.totalorder %s556_s10, %s556_s10 }
   0xd   :  { %p563_p6 = por %p562_p5, %p561_p4 }
   0xf   :  { %p564_p7 = pnand %p563_p6, %p557_p3 }
  0x11   :  { %567 = shalt.err (!%p564_p7)
}
  0x12   :  { %s665_s11 = smov 64   ;;  %s666_s12 = smov 4  }
  0x13   :  { %39 = dma.hbm_to_vmem [thread:$0]  %s827_s1, 128, %s34_s25, [#allocation6], %s665_s11, %s665_s11, %s666_s12  }
  0x14   :  { %s667_s15 = smov [#allocation2]   ;;  %s568_s19 = scalar_lea.hbm %s826_s0, 256 }
  0x15   :  { %s21_s16 = sshll.u32 %s667_s15, 4  ;;  %p569_p8 = scmp.ne.s32.totalorder %s826_s0, %s568_s19  ;;  %s22_s16 = int_to_ptr.vmem [resolvable:$true] %s21_s16 }
  0x16   :  { %p572_p9 = scmp.lt.u32.totalorder %s568_s19, %s826_s0 }
  0x18   :  { %p574_p10 = pnand %p572_p9, %p569_p8 }
  0x1a   :  { %577 = shalt.err (!%p574_p10)
}
  0x1b   :  { %s578_s24 = scalar_lea.vmem %s22_s16, 256  ;;  %p583_p12 = scmp.lt.s32.totalorder %s22_s16, %s22_s16 }
  0x1c   :  { %p579_p11 = scmp.ne.s32.totalorder %s22_s16, %s578_s24  ;;  %p584_p13 = scmp.lt.s32.totalorder %s578_s24, %s578_s24 }
  0x1e   :  { %p585_p0 = por %p584_p13, %p583_p12 }
  0x20   :  { %p586_p1 = pnand %p585_p0, %p579_p11 }
  0x22   :  { %589 = shalt.err (!%p586_p1)
}
  0x23   :  { %s668_s1 = smov 128   ;;  %s669_s25 = smov 8  }
  0x24   :  { %27 = dma.hbm_to_vmem [thread:$0]  %s826_s0, 256, %s22_s16, [#allocation3], %s668_s1, %s668_s1, %s669_s25  }
  0x25   :  { %s670_s28 = smov [#allocation7]   ;;  %s671_s30 = smov [#allocation8]  }
  0x26   :  { %s47_s29 = sshll.u32 %s670_s28, 4  ;;  %s61_s8 = sshll.u32 %s671_s30, 4  ;;  %s48_s29 = int_to_ptr.vmem [resolvable:$true] %s47_s29  ;;  %s742_s8 = int_to_ptr.vmem [resolvable:$true] %s61_s8 }
  0x27   :  { %s590_s13 = scalar_lea.hbm %s829_s3, 1024 }
  0x28   :  { %p591_p2 = scmp.ne.s32.totalorder %s829_s3, %s590_s13  ;;  %p594_p3 = scmp.lt.u32.totalorder %s590_s13, %s829_s3 }
  0x2a   :  { %p596_p4 = pnand %p594_p3, %p591_p2 }
  0x2c   :  { %599 = shalt.err (!%p596_p4)
}
  0x2d   :  { %s600_s0 = scalar_lea.vmem %s48_s29, 1024  ;;  %p605_p6 = scmp.lt.s32.totalorder %s48_s29, %s48_s29 }
  0x2e   :  { %p601_p5 = scmp.ne.s32.totalorder %s48_s29, %s600_s0  ;;  %p606_p7 = scmp.lt.s32.totalorder %s600_s0, %s600_s0 }
  0x30   :  { %p607_p8 = por %p606_p7, %p605_p6 }
  0x32   :  { %p608_p9 = pnand %p607_p8, %p601_p5 }
  0x34   :  { %611 = shalt.err (!%p608_p9)
}
  0x35   :  { %53 = dma.hbm_to_vmem [thread:$0]  %s829_s3, 1024, %s48_s29, [#allocation6], %s665_s11, %s665_s11, %s666_s12  }
  0x36   :  { %s612_s22 = scalar_lea.hbm %s831_s5, 1024 }
  0x37   :  { %p613_p10 = scmp.ne.s32.totalorder %s831_s5, %s612_s22  ;;  %p616_p11 = scmp.lt.u32.totalorder %s612_s22, %s831_s5 }
  0x39   :  { %p618_p12 = pnand %p616_p11, %p613_p10 }
  0x3b   :  { %621 = shalt.err (!%p618_p12)
}
  0x3c   :  { %s622_s26 = scalar_lea.vmem %s742_s8, 1024  ;;  %p627_p0 = scmp.lt.s32.totalorder %s742_s8, %s742_s8 }
  0x3d   :  { %p623_p13 = scmp.ne.s32.totalorder %s742_s8, %s622_s26  ;;  %p628_p1 = scmp.lt.s32.totalorder %s622_s26, %s622_s26 }
  0x3f   :  { %p629_p2 = por %p628_p1, %p627_p0 }
  0x41   :  { %p630_p3 = pnand %p629_p2, %p623_p13 }
  0x43   :  { %633 = shalt.err (!%p630_p3)
}
  0x44   :  { %67 = dma.hbm_to_vmem [thread:$0]  %s831_s5, 1024, %s742_s8, [#allocation9], %s665_s11, %s665_s11, %s666_s12  }
  0x45   :  { %656 = dma.done.wait [#allocation3], 256  }
  0x46   :  { %657 = vsyncadd [#allocation3], 4294967040 }
  0x47   :  { %658 = dma.done.wait [#allocation6], 1152  }
  0x48   :  { %659 = vsyncadd [#allocation6], 4294966144 }
  0x49   :  { %660 = dma.done.wait [#allocation9], 1024  }
  0x4a   :  { %661 = vsyncadd [#allocation9], 4294966272  ;;  %v672_v0 = vmov 0.0   ;;  %vm673_vm0 = vmmov 0   ;;  %v525_v1 = vld [vmem:[#allocation5] sm:$0xff]   ;;  %v83_v2 = vld [vmem:[#allocation2] sm:$0xff]  ;;  %v384_v48 = vlaneseq }
  0x4b   :  { %468 = vmatprep.subr.bf16.mxu0 %v672_v0  ;;  %470 = vmatprep.mubr.msk.bf16.mxu0 %vm673_vm0, %v672_v0  ;;  %v84_v3 = vld [vmem:[#allocation2 + $0x8] sm:$0xff]  ;;  %vm101_vm1 = vcmask 130048   ;;  %v526_v5 = vld [vmem:[#allocation7] sm:$0xff]   ;;  %v527_v6 = vld [vmem:[#allocation7 + $0x8] sm:$0xff]  }
  0x4c   :  { %474 = vmatprep.subr.bf16.mxu1 %v672_v0  ;;  %490 = vmatprep.mubr.msk.bf16.mxu1 %vm673_vm0, %v672_v0  ;;  %v85_v4 = vpack.c.bf16 %v84_v3, %v83_v2  ;;  %v528_v7 = vld [vmem:[#allocation7 + $0x10] sm:$0xff]   ;;  %v529_v8 = vld [vmem:[#allocation7 + $0x18] sm:$0xff]   ;;  %v530_v9 = vld [vmem:[#allocation7 + $0x20] sm:$0xff]   ;;  %v385_v52 = vand.u32 127, %v384_v48 }
  0x4d   :  { %469 = vmatpush3.bf16.msra.mxu0 %v525_v1  ;;  %475 = vmatpush3.bf16.msra.mxu1 %v526_v5  ;;  %v531_v10 = vld [vmem:[#allocation7 + $0x28] sm:$0xff]   ;;  %v532_v11 = vld [vmem:[#allocation7 + $0x30] sm:$0xff]   ;;  %v533_v12 = vld [vmem:[#allocation7 + $0x38] sm:$0xff]  }
  0x4e   :  { %494 = vmatprep.subr.bf16.mxu0 %v672_v0  ;;  %476 = vmatprep.subr.bf16.mxu1 %v672_v0  ;;  %v534_v13 = vld [vmem:[#allocation8] sm:$0xff]   ;;  %v535_v14 = vld [vmem:[#allocation8 + $0x8] sm:$0xff]   ;;  %v536_v15 = vld [vmem:[#allocation8 + $0x10] sm:$0xff]   ;;  %vm386_vm2 = vcmp.ge.s32.totalorder %v385_v52, 64 }
  0x4f   :  { %v537_v16 = vld [vmem:[#allocation8 + $0x18] sm:$0xff]   ;;  %v538_v17 = vld [vmem:[#allocation8 + $0x20] sm:$0xff]   ;;  %v539_v18 = vld [vmem:[#allocation8 + $0x28] sm:$0xff]  }
  0x50   :  { %471 = vmatmul.mubr.msk.bf16.vlgmr.msra.gmra.mrb[0].mxu0 %vm101_vm1, %v85_v4  ;;  %v418_v19 = vld [vmem:[%s828_s2] ss:$0 sm:$0xff]  ;;  %v540_v29 = vld [vmem:[#allocation8 + $0x30] sm:$0xff]   ;;  %v541_v30 = vld [vmem:[#allocation8 + $0x38] sm:$0xff]  }
  0x51   :  { %510 = vmatprep.mubr.msk.bf16.mxu0 %vm673_vm0, %v672_v0  ;;  %477 = vmatpush3.bf16.msra.mxu1 %v527_v6  ;;  %v421_v31 = vld [vmem:[%s830_s4] ss:$0 sm:$0xff]  ;;  %s674_s4 = smov [#allocation10]  }
  0x52   :  { %478 = vmatprep.subr.bf16.mxu1 %v672_v0  ;;  %495 = vmatpush3.bf16.msra.mxu0 %v534_v13  ;;  %v430_v41 = vld [vmem:[%s832_s6] ss:$0 sm:$0xff]  ;;  %s404_s6 = sshll.u32 %s674_s4, 4  ;;  %s405_s6 = int_to_ptr.vmem [resolvable:$true] %s404_s6 }
  0x53   :  { %496 = vmatprep.subr.bf16.mxu0 %v672_v0  ;;  %s634_s9 = scalar_lea.vmem %s405_s6, 128  ;;  %p639_p5 = scmp.lt.s32.totalorder %s405_s6, %s405_s6 }
  0x54   :  { %p635_p4 = scmp.ne.s32.totalorder %s405_s6, %s634_s9  ;;  %p640_p6 = scmp.lt.s32.totalorder %s634_s9, %s634_s9 }
  0x55   :  { %479 = vmatpush3.bf16.msra.mxu1 %v528_v7 }
  0x56   :  { %480 = vmatprep.subr.bf16.mxu1 %v672_v0  ;;  %497 = vmatpush3.bf16.msra.mxu0 %v535_v14  ;;  %p641_p7 = por %p640_p6, %p639_p5 }
  0x57   :  { %498 = vmatprep.subr.bf16.mxu0 %v672_v0 }
  0x58   :  { %p642_p8 = pnand %p641_p7, %p635_p4 }
  0x59   :  { %481 = vmatpush3.bf16.msra.mxu1 %v529_v8 }
  0x5a   :  { %482 = vmatprep.subr.bf16.mxu1 %v672_v0  ;;  %499 = vmatpush3.bf16.msra.mxu0 %v536_v15 }
  0x5b   :  { %500 = vmatprep.subr.bf16.mxu0 %v672_v0 }
  0x5d   :  { %483 = vmatpush3.bf16.msra.mxu1 %v530_v9 }
  0x5e   :  { %484 = vmatprep.subr.bf16.mxu1 %v672_v0  ;;  %501 = vmatpush3.bf16.msra.mxu0 %v537_v16 }
  0x5f   :  { %502 = vmatprep.subr.bf16.mxu0 %v672_v0 }
  0x61   :  { %485 = vmatpush3.bf16.msra.mxu1 %v531_v10 }
  0x62   :  { %486 = vmatprep.subr.bf16.mxu1 %v672_v0  ;;  %503 = vmatpush3.bf16.msra.mxu0 %v538_v17 }
  0x63   :  { %504 = vmatprep.subr.bf16.mxu0 %v672_v0 }
  0x65   :  { %487 = vmatpush3.bf16.msra.mxu1 %v532_v11 }
  0x66   :  { %488 = vmatprep.subr.bf16.mxu1 %v672_v0  ;;  %505 = vmatpush3.bf16.msra.mxu0 %v539_v18 }
  0x67   :  { %506 = vmatprep.subr.bf16.mxu0 %v672_v0 }
  0x69   :  { %489 = vmatpush3.bf16.msra.mxu1 %v533_v12 }
  0x6a   :  { %507 = vmatpush3.bf16.msra.mxu0 %v540_v29 }
  0x6b   :  { %508 = vmatprep.subr.bf16.mxu0 %v672_v0 }
  0x6e   :  { %509 = vmatpush3.bf16.msra.mxu0 %v541_v30 }
 0x123   :  { %v139_v20 = vpop.f32.mrb[0].mxu0 }
 0x124   :  { %v140_v21 = vadd.f32 %v418_v19, %v139_v20  ;;  %v472_v22 = vpop.f32.mrb[1].mxu0 }
 0x125   :  { %v142_v23 = vpop.f32.mrb[2].mxu0 }
 0x126   :  { %v143_v24 = vadd.f32 %v418_v19, %v142_v23  ;;  %v473_v25 = vpop.f32.mrb[3].mxu0  ;;  %v146_v26 = vmax.f32 %v140_v21, 0.0 }
 0x128   :  { %v147_v27 = vmax.f32 %v143_v24, 0.0 }
 0x12a   :  { %v148_v28 = vpack.c.bf16 %v147_v27, %v146_v26 }
 0x12c   :  { %491 = vmatmul.mubr.bf16.vlgmr.msra.gmra.mrb[0].mxu1 %v148_v28 }
 0x1ff   :  { %v254_v32 = vpop.f32.mrb[0].mxu1 }
 0x200   :  { %v255_v33 = vadd.f32 %v421_v31, %v254_v32  ;;  %v492_v34 = vpop.f32.mrb[1].mxu1 }
 0x201   :  { %v257_v35 = vpop.f32.mrb[2].mxu1 }
 0x202   :  { %v258_v36 = vadd.f32 %v421_v31, %v257_v35  ;;  %v493_v37 = vpop.f32.mrb[3].mxu1  ;;  %v261_v38 = vmax.f32 %v255_v33, 0.0 }
 0x204   :  { %v262_v39 = vmax.f32 %v258_v36, 0.0 }
 0x206   :  { %v263_v40 = vpack.c.bf16 %v262_v39, %v261_v38 }
 0x208   :  { %511 = vmatmul.mubr.bf16.vlgmr.msra.gmra.mrb[4].mxu0 %v263_v40 }
 0x2db   :  { %v369_v42 = vpop.f32.mrb[4].mxu0 }
 0x2dc   :  { %v370_v43 = vadd.f32 %v430_v41, %v369_v42  ;;  %v512_v44 = vpop.f32.mrb[5].mxu0 }
 0x2dd   :  { %v372_v45 = vpop.f32.mrb[6].mxu0 }
 0x2de   :  { %542 = vtanh.f32 %v370_v43  ;;  %v373_v46 = vadd.f32 %v430_v41, %v372_v45  ;;  %v513_v47 = vpop.f32.mrb[7].mxu0 }
 0x2e0   :  { %544 = vtanh.f32 %v373_v46 }
 0x2e8   :  { %v543_v49 = vpop.eup %542 }
 0x2e9   :  { %v378_v50 = vadd.f32 1.0, %v543_v49 }
 0x2ea   :  { %v545_v51 = vpop.eup %544 }
 0x2eb   :  { %v380_v53 = vmul.f32 2.55, %v378_v50  ;;  %v379_v54 = vadd.f32 1.0, %v545_v51 }
 0x2ed   :  { %v382_v55 = vadd.f32 -5.0, %v380_v53  ;;  %v381_v56 = vmul.f32 2.55, %v379_v54 }
 0x2ef   :  { %v383_v57 = vadd.f32 -5.0, %v381_v56  ;;  %v387_v58 = vsel %vm386_vm2, %v382_v55, %v370_v43 }
 0x2f1   :  { %v388_v59 = vsel %vm386_vm2, %v383_v57, %v373_v46 }
 0x2f2   :  { %v446_v60 = vpack.c.bf16 %v388_v59, %v387_v58 }
 0x2f4   :  { %447 = vst [vmem:[#allocation10] sm:$0xff] %v446_v60  }
 0x2f5   :  { %645 = shalt.err (!%p642_p8)
}
 0x2f6   :  { %s646_s14 = scalar_lea.hbm %s833_s7, 128 }
 0x2f7   :  { %p647_p9 = scmp.ne.s32.totalorder %s833_s7, %s646_s14  ;;  %p650_p10 = scmp.lt.u32.totalorder %s646_s14, %s833_s7 }
 0x2f9   :  { %p652_p11 = pnand %p650_p10, %p647_p9 }
 0x2fb   :  { %655 = shalt.err (!%p652_p11)
}
 0x2fc   :  { %410 = dma.vmem_to_hbm [thread:$0]  %s405_s6, 128, %s833_s7, [#allocation4], %s665_s11, %s665_s11, %s666_s12  }
 0x2fd   :  { %662 = dma.done.wait [#allocation4], 128  }
 0x2fe   :  { %663 = vsyncadd [#allocation4], 4294967168 }
 0x2ff   :  { %414 = vsyncpa [#allocation3], 1 }
 0x300   :  { %415 = vsyncpa [#allocation6], 1 }
 0x301   :  { %416 = vsyncpa [#allocation9], 1 }
 0x302   :  { %417 = vsyncpa [#allocation4], 1 }

</bundles_post_ra>
